<compile_context>
chip_gen: v7x
topology: tpu7x:2x2x1
jax: 0.10.0
libtpu: 0.0.40
codegen_flags: <defaults>
</compile_context>

<pallas_src>
import math

import jax
import jax.numpy as jnp
from jax.experimental import pallas as pl
from jax.experimental.pallas import tpu as pltpu

_MAX_TB = 512                        # batch-tile cap (multiple of 8 and 16)
_MAX_TF_BYTES = 2048 * 4             # feature-tile cap in BYTES per row class
_SMALL_BYTES = 256 * 1024            # below this, plain jnp (XLA fusion) wins
_VMEM_LIMIT_BYTES = 40 * 1024 * 1024 # explicit scoped-VMEM request


def _drop_path_kernel(x_ref, mask_ref, o_ref):
    # out = x * (keep_mask / keep_prob); mask block is [TB, 1] (f32) and
    # broadcasts over the lane-dense feature axis; cast back to out dtype.
    o_ref[...] = (x_ref[...] * mask_ref[...]).astype(o_ref.dtype)


def _round_up(v: int, m: int) -> int:
    return ((v + m - 1) // m) * m


def drop_path(x, key, drop_prob: float = 0.0, training: bool = False):
    """JAX/Pallas equivalent of timm's drop_path (stochastic depth).

    x: [B, ...] floating array (e.g. NCHW). key: jax PRNG key (only used when active).
    """
    if drop_prob == 0.0 or not training:
        return x
    assert jnp.issubdtype(x.dtype, jnp.floating), "drop_path expects a floating dtype"

    keep_prob = 1.0 - drop_prob
    B = x.shape[0]
    feat = math.prod(x.shape[1:]) if x.ndim > 1 else 1

    # Per-sample keep mask in f32 (avoids bf16 rounding bias), pre-scaled by
    # 1/keep_prob so the kernel is a single multiply.
    u = jax.random.uniform(key, (B, 1), dtype=jnp.float32)
    scaled_mask = jnp.floor(keep_prob + u) * jnp.float32(1.0 / keep_prob)

    itemsize = jnp.dtype(x.dtype).itemsize

    # Fast path: lane-narrow or tiny arrays -> masked partial stores + launch /
    # per-step overhead would dominate a standalone pallas_call; let XLA fuse.
    if feat < 128 or x.size * itemsize < _SMALL_BYTES:
        bshape = (B,) + (1,) * (x.ndim - 1)
        return (x * scaled_mask.reshape(bshape)).astype(x.dtype)

    x2d = x.reshape(B, feat)

    # Dtype-aware tile caps: constant byte footprint (~4 MiB) across dtypes.
    max_tf = max(128, (_MAX_TF_BYTES // itemsize) // 128 * 128)
    TB = B if B <= _MAX_TB else _MAX_TB
    TF = feat if feat <= max_tf else max_tf
    grid = (pl.cdiv(B, TB), pl.cdiv(feat, TF))

    # v7x megacore: a single-block grid leaves one TensorCore idle — split the
    # lane-dense feature axis into >=2 blocks (harmless on single-TC v5e/v6e).
    if grid == (1, 1) and feat >= 256:
        TF = _round_up(pl.cdiv(feat, 2), 128)
        grid = (1, pl.cdiv(feat, TF))

    out2d = pl.pallas_call(
        _drop_path_kernel,
        out_shape=jax.ShapeDtypeStruct((B, feat), x.dtype),
        grid=grid,
        in_specs=[
            pl.BlockSpec((TB, TF), lambda i, j: (i, j)),
            pl.BlockSpec((TB, 1), lambda i, j: (i, 0)),  # mask reused across j
        ],
        out_specs=pl.BlockSpec((TB, TF), lambda i, j: (i, j)),
        input_output_aliases={0: 0},  # write result in place of x2d
        compiler_params=pltpu.CompilerParams(
            dimension_semantics=("parallel", "parallel"),
            vmem_limit_bytes=_VMEM_LIMIT_BYTES,
        ),
    )(x2d, scaled_mask)

    return out2d.reshape(x.shape)


class DropPath:
    """Stateless DropPath module (drop_prob set at init, training flag at call)."""

    def __init__(self, drop_prob=None):
        self.drop_prob = 0.0 if drop_prob is None else float(drop_prob)

    def __call__(self, x, key, training: bool = False):
        return drop_path(x, key, self.drop_prob, training)


def _reference(x, key, drop_prob):
    keep_prob = 1.0 - drop_prob
    B = x.shape[0]
    u = jax.random.uniform(key, (B, 1), dtype=jnp.float32)
    mask = jnp.floor(keep_prob + u).reshape((B,) + (1,) * (x.ndim - 1))
    return (x / keep_prob * mask).astype(x.dtype)


if __name__ == "__main__":
    key = jax.random.PRNGKey(0)
    kx1, km1, kx2, km2 = jax.random.split(key, 4)

    drop_prob = 0.25
    module = DropPath(drop_prob)

    # --- Test 1: canonical small shape (fast jnp path; feat=1024, 8 KiB). ---
    B, C, H, W = 2, 4, 16, 16
    x_small = jax.random.normal(kx1, (B, C, H, W), dtype=jnp.float32)
    out_small = jax.block_until_ready(module(x_small, km1, training=True))
    ref_small = _reference(x_small, km1, drop_prob)
    assert out_small.shape == x_small.shape and out_small.dtype == x_small.dtype
    assert jnp.allclose(out_small, ref_small, atol=1e-6, rtol=1e-6)

    # Eval-mode / drop_prob=0 forward is identity (no kernel launch).
    out_eval = module(x_small, km1, training=False)
    assert jnp.array_equal(out_eval, x_small)

    # --- Test 2: Pallas path with tiled + partial trailing feature blocks. ---
    # feat = 5*40*25 = 5000 > TF cap (2048 f32) -> grid (1, 3), trailing block
    # of 904 exercises masked stores; 480 KiB is above the fast-path cutoff.
    B2, C2, H2, W2 = 24, 5, 40, 25
    x_big = jax.random.normal(kx2, (B2, C2, H2, W2), dtype=jnp.float32)
    out_big = jax.block_until_ready(module(x_big, km2, training=True))
    ref_big = _reference(x_big, km2, drop_prob)
    assert out_big.shape == x_big.shape and out_big.dtype == x_big.dtype
    assert jnp.allclose(out_big, ref_big, atol=1e-6, rtol=1e-6)

    print("KERNEL_OK")
</pallas_src>

<mosaic_0001>
module attributes {stable_mosaic.version = 11 : i64} {
  func.func @_drop_path_kernel(%arg0: i32, %arg1: i32, %arg2: memref<24x2048xf32, #tpu.memory_space<vmem>>, %arg3: memref<24x1xf32, #tpu.memory_space<vmem>>, %arg4: memref<24x2048xf32, #tpu.memory_space<vmem>>) attributes {dimension_semantics = [#tpu.dimension_semantics<parallel>, #tpu.dimension_semantics<parallel>], iteration_bounds = array<i64: 1, 3>, scalar_prefetch = 0 : i64, scratch_operands = 0 : i64, tpu.core_type = #tpu.core_type<tc>, window_params = [{transform_indices = @transform_0, window_bounds = array<i64: 24, 2048>}, {transform_indices = @transform_1, window_bounds = array<i64: 24, 1>}, {transform_indices = @transform_2, window_bounds = array<i64: 24, 2048>}]} {
    %c0 = arith.constant 0 : index
    %c0_0 = arith.constant 0 : index
    %0 = vector.load %arg2[%c0, %c0_0] : memref<24x2048xf32, #tpu.memory_space<vmem>>, vector<24x2048xf32>
    %c0_1 = arith.constant 0 : index
    %c0_2 = arith.constant 0 : index
    %1 = vector.load %arg3[%c0_1, %c0_2] : memref<24x1xf32, #tpu.memory_space<vmem>>, vector<24x1xf32>
    %2 = vector.broadcast %1 : vector<24x1xf32> to vector<24x2048xf32>
    %3 = arith.mulf %0, %2 : vector<24x2048xf32>
    %c0_3 = arith.constant 0 : index
    %c0_4 = arith.constant 0 : index
    %4 = vector.load %arg4[%c0_3, %c0_4] : memref<24x2048xf32, #tpu.memory_space<vmem>>, vector<24x2048xf32>
    tpu.vector_store %arg4[%c0_3, %c0_4], %3 {strides = array<i32>} : memref<24x2048xf32, #tpu.memory_space<vmem>>, vector<24x2048xf32>,
    return
  }
  func.func @transform_0(%arg0: i32, %arg1: i32) -> (i32, i32) {
    %c0_i32 = arith.constant 0 : i32
    return %arg0, %arg1 : i32, i32
  }
  func.func @transform_1(%arg0: i32, %arg1: i32) -> (i32, i32) {
    %c0_i32 = arith.constant 0 : i32
    %c0_i32_0 = arith.constant 0 : i32
    return %arg0, %c0_i32 : i32, i32
  }
  func.func @transform_2(%arg0: i32, %arg1: i32) -> (i32, i32) {
    %c0_i32 = arith.constant 0 : i32
    return %arg0, %arg1 : i32, i32
  }
}

</mosaic_0001>

<bundles_post_ra>
// kernel: tpu_custom_call.1
= control target key start
LH: loop header
LB: loop body
LE: loop exit
PB: predicated region body
PF: predicated region fallthrough
CT: control target
= control target key end

     0   :  { %7 = vsyncpa [#allocation3], 0  ;;  %s1052_s0 = inlined_call_operand.hbm [shape: f32[24,5000], index: 0, kind: input, shape index: {}, may-alias: {0,2}]   ;;  %s1053_s1 = inlined_call_operand.vmem [shape: f32[24,1], index: 1, kind: input, shape index: {}]   ;;  %s1054_s2 = inlined_call_operand.hbm [shape: f32[24,5000], index: 2, kind: output, shape index: {}, may-alias: {0,2}]  }
   0x1   :  { %9 = vsyncpa [#allocation3 + $0x1], 0 }
   0x2   :  { %10 = vsyncpa [#allocation4], 0 }
   0x3   :  { %12 = vsyncpa [#allocation4 + $0x1], 0  ;;  %s730_s9 = smov 0   ;;  %s732_s10 = smov 0  }
   0x4   :  { %s734_s11 = smov 0   ;;  %s736_s12 = smov 0  }
   0x5   :  { %s738_s13 = smov 0   ;;  %s740_s14 = smov 0  }
   0x6 LB: > { %s510_s15 = sadd.s32 4294967295, %s706_s14   ;;  %s511_s16 = sadd.s32 4294967294, %s706_s14   ;;  %s706_s14 = sphi %s740_s14, %s18_s14   ;;  %s702_s13 = sphi %s738_s13, %s1063_s13   ;;  %s698_s12 = sphi %s736_s12, %s1062_s12   ;;  %s694_s11 = sphi %s734_s11, %s1061_s11   ;;  %s690_s10 = sphi %s732_s10, %s1060_s10   ;;  %s686_s9 = sphi %s730_s9, %s1059_s9  }
   0x7   : > { %s27_s17 = sadd.s32 1, %s702_s13  ;;  %s39_s18 = sadd.s32 1, %s694_s11 }
   0x8   : > { %p28_p0 = scmp.ge.s32.totalorder %s27_s17, 3  ;;  %p46_p1 = scmp.ne.s32.totalorder %s694_s11, %s690_s10 }
   0x9   : > { %p47_p2 = scmp.eq.s32.totalorder %s706_s14, 0  ;;  %p52_p3 = scmp.ne.s32.totalorder %s690_s10, %s686_s9 }
   0xa   : > { %s1065_s17 = smov (%p28_p0, %s27_s17), 0  ;;  %p53_p5 = scmp.eq.s32.totalorder %s510_s15, 0 }
   0xb   : > { %p48_p4 = por %p47_p2, %p46_p1  ;;  %s35_s19 = ssub.s32 %s702_s13, %s1065_s17 }
   0xc   : > { %p104_p6 = scmp.eq.s32.totalorder %s510_s15, 2  ;;  %p37_p7 = scmp.eq.s32.totalorder %s35_s19, 0 }
   0xd   : > { %p773_p8 = por %p53_p5, %p52_p3  ;;  %p110_p10 = scmp.eq.s32.totalorder %s511_s16, 2 }
   0xe   : > { %p777_p9 = por %p104_p6, %p46_p1  ;;  %p514_p12 = scmp.ge.s32.totalorder %s706_s14, 3 }
   0xf   : > { %s782_s22 = scalar_select %p37_p7, %s694_s11, %s39_s18  }
  0x10   : > { %p784_p11 = por %p110_p10, %p52_p3  ;;  %135 = sbr.rel (%p514_p12) target bundleno = 59 (0x3b), region = 20 }
  0x12   : > { %s1057_s23 = scalar_select %p784_p11, 1, 0 }
  0x17   : > { %138 = sbr.rel (!%p48_p4) target bundleno = 59 (0x3b), region = 24  ;;  %s139_s24 = sand.u32 (%p48_p4), 1, %s694_s11  }
  0x18   : > { %s515_s25 = sshll.u32 (%p48_p4), %s702_s13, 4  ;;  %s532_s26 = smul.u32 (%p48_p4), 384, %s139_s24 }
  0x19   : > { %s146_s27 = ssub.s32 (%p48_p4), 40, %s515_s25  ;;  %s797_s30 = scalar_lea.sflag (%p48_p4), [#allocation3], %s139_s24 }
  0x1a   : > { %p147_p13 = scmp.lt.s32.totalorder (%p48_p4), %s146_s27, 16  ;;  %s143_s3 = scalar_lea.vmem (%p48_p4), [#allocation2], %s532_s26 }
  0x1e   : > { %s1067_s27 = smov (!%p147_p13, %s146_s27), 16 }
  0x1f   : > { %s794_s28 = smul.u32 384, %s1067_s27 }
  0x21   : > { %s151_s29 = ssub.s32 6144, %s794_s28 }
  0x22   : > { %152 = vsyncadd %s797_s30, %s151_s29  ;;  %p516_p0 = scmp.ne.s32.totalorder %s794_s28, 0  ;;  %s530_s4 = sshll.u32 %s702_s13, 11 }
  0x23   : > { %s805_s7 = scalar_lea.hbm %s1052_s0, %s530_s4  ;;  %s518_s8 = sshll.u32 %s1067_s27, 3 }
  0x24   : > { %s160_s15 = sshll.u32 %s143_s3, 4  ;;  %s596_s16 = scalar_lea.hbm %s805_s7, %s794_s28  ;;  %s808_s15 = int_to_ptr.vmem [resolvable:$true] %s160_s15 }
  0x25   : > { %p597_p1 = scmp.ne.s32.totalorder %s805_s7, %s596_s16  ;;  %s600_s24 = scalar_lea.hbm %s1052_s0, 15360 }
  0x26   : > { %p601_p4 = scmp.lt.u32.totalorder %s805_s7, %s1052_s0  ;;  %p602_p5 = scmp.lt.u32.totalorder %s600_s24, %s596_s16 }
  0x27   : > { %p598_p2 = pnand %p597_p1, %p516_p0  ;;  %p604_p7 = scmp.lt.u32.totalorder %s596_s16, %s805_s7 }
  0x28   : > { %p603_p6 = por %p602_p5, %p601_p4 }
  0x29   : > { %p599_p3 = pneg %p598_p2 }
  0x2a   : > { %p605_p10 = por %p604_p7, %p603_p6 }
  0x2c   : > { %p606_p12 = pnand %p605_p10, %p599_p3 }
  0x2e   : > { %609 = shalt.err (!%p606_p12)
}
  0x2f   : > { %s610_s29 = scalar_lea.vmem %s808_s15, %s794_s28  ;;  %s708_s3 = smov [#allocation2]  }
  0x30   : > { %p611_p13 = scmp.ne.s32.totalorder %s808_s15, %s610_s29  ;;  %s614_s4 = sshll.u32 %s708_s3, 4  ;;  %s615_s4 = int_to_ptr.vmem [resolvable:$false] %s614_s4 }
  0x31   : > { %s616_s5 = scalar_lea.vmem %s615_s4, 12288  ;;  %p617_p11 = scmp.lt.s32.totalorder %s808_s15, %s615_s4 }
  0x32   : > { %p612_p1 = pnand %p611_p13, %p516_p0  ;;  %p618_p4 = scmp.lt.s32.totalorder %s616_s5, %s610_s29 }
  0x34   : > { %p613_p2 = pneg %p612_p1  ;;  %p619_p5 = por %p618_p4, %p617_p11 }
  0x36   : > { %p620_p6 = pnand %p619_p5, %p613_p2 }
  0x38   : > { %623 = shalt.err (!%p620_p6)
}
  0x39   : > { %s709_s6 = smov 5120   ;;  %s710_s16 = smov 2048  }
  0x3a   : > { %166 = dma.hbm_to_vmem [thread:$0]  (%p516_p0), %s805_s7, %s794_s28, %s808_s15, %s797_s30, %s709_s6, %s710_s16, %s518_s8  }
  0x3b PF: > { %p521_p3 = scmp.ge.s32.totalorder %s706_s14, 1  ;;  %p168_p7 = scmp.lt.s32.totalorder %s706_s14, 4 }
  0x3d   : > { %p169_p11 = pnand %p521_p3, %p168_p7 }
  0x3e   : > { %s840_s18 = sand.u32 (!%p169_p11), 1, %s690_s10  }
  0x3f   : > { %172 = sbr.rel (%p169_p11) target bundleno = 258 (0x102), region = 28  ;;  %s175_s24 = scalar_lea.sflag (!%p169_p11), [#allocation3], %s840_s18 }
  0x40   : > { %s533_s19 = smul.u32 (!%p169_p11), 384, %s840_s18 }
  0x42   : > { %s846_s27 = scalar_lea.vmem (!%p169_p11), [#allocation2], %s533_s19 }
  0x46   : > { %677 = dma.done.wait (%p773_p8), %s175_s24, 6144  }
  0x47   : > { %679 = vsyncadd (%p773_p8), %s175_s24, 4294961152  ;;  %v711_v0 = vmov 0   ;;  %v270_v1 = vld [vmem:[%s1053_s1] sm:$0xff]  ;;  %v272_v2 = vld [vmem:[%s1053_s1 + $0x10] sm:$0xff]  ;;  %s892_s25 = scalar_lea.vmem [#allocation5], %s533_s19  ;;  %s385_s26 = scalar_lea.sflag [#allocation4], %s840_s18 }
  0x48   : > { %594 = vset.pattern.permute.xlu0 %v711_v0  ;;  %595 = vset.pattern.permute.xlu1 %v711_v0  ;;  %v271_v3 = vld [vmem:[%s1053_s1 + $0x8] sm:$0xff]  ;;  %v222_v4 = vld [vmem:[%s846_s27] sm:$0xff]  ;;  %v224_v6 = vld [vmem:[%s846_s27 + $0x10] sm:$0xff]  ;;  %s522_s29 = sshll.u32 (%p777_p9), %s698_s12, 4 }
  0x49   : > { %275 = vperm.xlu0 %594, %v270_v1   ;;  %285 = vperm.xlu1 %595, %v272_v2   ;;  %v223_v5 = vld [vmem:[%s846_s27 + $0x8] sm:$0xff]  ;;  %v225_v7 = vld [vmem:[%s846_s27 + $0x18] sm:$0xff]  ;;  %v226_v8 = vld [vmem:[%s846_s27 + $0x20] sm:$0xff]  ;;  %s394_s3 = ssub.s32 (%p777_p9), 40, %s522_s29 }
  0x4a   : > { %v227_v9 = vld [vmem:[%s846_s27 + $0x28] sm:$0xff]  ;;  %v228_v10 = vld [vmem:[%s846_s27 + $0x30] sm:$0xff]  ;;  %v229_v11 = vld [vmem:[%s846_s27 + $0x38] sm:$0xff]  ;;  %p395_p8 = scmp.lt.s32.totalorder (%p777_p9), %s394_s3, 16 }
  0x4b   : > { %v230_v12 = vld [vmem:[%s846_s27 + $0x40] sm:$0xff]  ;;  %v231_v13 = vld [vmem:[%s846_s27 + $0x48] sm:$0xff]  ;;  %v232_v14 = vld [vmem:[%s846_s27 + $0x50] sm:$0xff] }
  0x4c   : > { %v233_v15 = vld [vmem:[%s846_s27 + $0x58] sm:$0xff]  ;;  %v234_v16 = vld [vmem:[%s846_s27 + $0x60] sm:$0xff]  ;;  %v235_v17 = vld [vmem:[%s846_s27 + $0x68] sm:$0xff] }
  0x4d   : > { %280 = vperm.xlu0 %594, %v271_v3   ;;  %v236_v18 = vld [vmem:[%s846_s27 + $0x70] sm:$0xff]  ;;  %v237_v19 = vld [vmem:[%s846_s27 + $0x78] sm:$0xff]  ;;  %v254_v21 = vld [vmem:[%s846_s27 + $0x100] sm:$0xff] }
  0x4e   : > { %v255_v22 = vld [vmem:[%s846_s27 + $0x108] sm:$0xff]  ;;  %v256_v23 = vld [vmem:[%s846_s27 + $0x110] sm:$0xff]  ;;  %v257_v24 = vld [vmem:[%s846_s27 + $0x118] sm:$0xff] }
  0x4f   : > { %v258_v29 = vld [vmem:[%s846_s27 + $0x120] sm:$0xff]  ;;  %v259_v30 = vld [vmem:[%s846_s27 + $0x128] sm:$0xff]  ;;  %v260_v31 = vld [vmem:[%s846_s27 + $0x130] sm:$0xff] }
  0x50   : > { %v261_v32 = vld [vmem:[%s846_s27 + $0x138] sm:$0xff]  ;;  %v262_v38 = vld [vmem:[%s846_s27 + $0x140] sm:$0xff]  ;;  %v263_v39 = vld [vmem:[%s846_s27 + $0x148] sm:$0xff] }
  0x51   : > { %v264_v40 = vld [vmem:[%s846_s27 + $0x150] sm:$0xff]  ;;  %v265_v45 = vld [vmem:[%s846_s27 + $0x158] sm:$0xff]  ;;  %v266_v46 = vld [vmem:[%s846_s27 + $0x160] sm:$0xff] }
  0x52   : > { %v267_v47 = vld [vmem:[%s846_s27 + $0x168] sm:$0xff]  ;;  %v268_v52 = vld [vmem:[%s846_s27 + $0x170] sm:$0xff]  ;;  %v269_v53 = vld [vmem:[%s846_s27 + $0x178] sm:$0xff] }
  0x53   : > { %v238_v54 = vld [vmem:[%s846_s27 + $0x80] sm:$0xff]  ;;  %v239_v59 = vld [vmem:[%s846_s27 + $0x88] sm:$0xff]  ;;  %v240_v60 = vld [vmem:[%s846_s27 + $0x90] sm:$0xff] }
  0x54   : > { %v241_v61 = vld [vmem:[%s846_s27 + $0x98] sm:$0xff]  ;;  %v242_v3 = vld [vmem:[%s846_s27 + $0xa0] sm:$0xff] }
  0xc8   : > { %v276_v20 = vpop.permute.xlu0 %275  ;;  %v885_v37 = vpop.permute.xlu1 %285 }
  0xc9   : > { %v288_v25 = vmul.f32 %v276_v20, %v222_v4  ;;  %v289_v26 = vmul.f32 %v276_v20, %v223_v5  ;;  %v290_v27 = vmul.f32 %v276_v20, %v224_v6  ;;  %v291_v28 = vmul.f32 %v276_v20, %v225_v7  ;;  %v243_v4 = vld [vmem:[%s846_s27 + $0xa8] sm:$0xff]  ;;  %v244_v5 = vld [vmem:[%s846_s27 + $0xb0] sm:$0xff] }
  0xca   : > { %v292_v33 = vmul.f32 %v276_v20, %v226_v8  ;;  %v293_v34 = vmul.f32 %v276_v20, %v227_v9  ;;  %v294_v35 = vmul.f32 %v276_v20, %v228_v10  ;;  %v295_v36 = vmul.f32 %v276_v20, %v229_v11  ;;  %v245_v10 = vld [vmem:[%s846_s27 + $0xb8] sm:$0xff]  ;;  %v246_v11 = vld [vmem:[%s846_s27 + $0xc0] sm:$0xff] }
  0xcb   : > { %v296_v41 = vmul.f32 %v276_v20, %v230_v12  ;;  %v297_v42 = vmul.f32 %v276_v20, %v231_v13  ;;  %v298_v43 = vmul.f32 %v276_v20, %v232_v14  ;;  %v299_v44 = vmul.f32 %v276_v20, %v233_v15  ;;  %336 = vst [vmem:[%s892_s25] sm:$0xff] %v288_v25  ;;  %v247_v12 = vld [vmem:[%s846_s27 + $0xc8] sm:$0xff] }
  0xcc   : > { %337 = vst [vmem:[%s892_s25 + $0x8] sm:$0xff] %v289_v26  ;;  %338 = vst [vmem:[%s892_s25 + $0x10] sm:$0xff] %v290_v27  ;;  %v300_v48 = vmul.f32 %v276_v20, %v234_v16  ;;  %v301_v49 = vmul.f32 %v276_v20, %v235_v17  ;;  %v302_v50 = vmul.f32 %v276_v20, %v236_v18  ;;  %v281_v2 = vpop.permute.xlu0 %280  ;;  %v248_v17 = vld [vmem:[%s846_s27 + $0xd0] sm:$0xff]  ;;  %v249_v18 = vld [vmem:[%s846_s27 + $0xd8] sm:$0xff] }
  0xcd   : > { %339 = vst [vmem:[%s892_s25 + $0x18] sm:$0xff] %v291_v28  ;;  %v303_v51 = vmul.f32 %v276_v20, %v237_v19  ;;  %340 = vst [vmem:[%s892_s25 + $0x20] sm:$0xff] %v292_v33  ;;  %v320_v55 = vmul.f32 %v885_v37, %v254_v21  ;;  %v321_v56 = vmul.f32 %v885_v37, %v255_v22  ;;  %v250_v19 = vld [vmem:[%s846_s27 + $0xe0] sm:$0xff]  ;;  %v251_v20 = vld [vmem:[%s846_s27 + $0xe8] sm:$0xff] }
  0xce   : > { %341 = vst [vmem:[%s892_s25 + $0x28] sm:$0xff] %v293_v34  ;;  %342 = vst [vmem:[%s892_s25 + $0x30] sm:$0xff] %v294_v35  ;;  %v322_v57 = vmul.f32 %v885_v37, %v256_v23  ;;  %v323_v58 = vmul.f32 %v885_v37, %v257_v24  ;;  %v324_v62 = vmul.f32 %v885_v37, %v258_v29  ;;  %v252_v21 = vld [vmem:[%s846_s27 + $0xf0] sm:$0xff]  ;;  %v253_v22 = vld [vmem:[%s846_s27 + $0xf8] sm:$0xff] }
  0xcf   : > { %343 = vst [vmem:[%s892_s25 + $0x38] sm:$0xff] %v295_v36  ;;  %344 = vst [vmem:[%s892_s25 + $0x40] sm:$0xff] %v296_v41  ;;  %v325_v63 = vmul.f32 %v885_v37, %v259_v30  ;;  %v326_v0 = vmul.f32 %v885_v37, %v260_v31  ;;  %v327_v1 = vmul.f32 %v885_v37, %v261_v32 }
  0xd0   : > { %345 = vst [vmem:[%s892_s25 + $0x48] sm:$0xff] %v297_v42  ;;  %346 = vst [vmem:[%s892_s25 + $0x50] sm:$0xff] %v298_v43  ;;  %v328_v6 = vmul.f32 %v885_v37, %v262_v38  ;;  %v329_v7 = vmul.f32 %v885_v37, %v263_v39  ;;  %v330_v8 = vmul.f32 %v885_v37, %v264_v40 }
  0xd1   : > { %347 = vst [vmem:[%s892_s25 + $0x58] sm:$0xff] %v299_v44  ;;  %348 = vst [vmem:[%s892_s25 + $0x60] sm:$0xff] %v300_v48  ;;  %v331_v9 = vmul.f32 %v885_v37, %v265_v45  ;;  %v332_v13 = vmul.f32 %v885_v37, %v266_v46  ;;  %v333_v14 = vmul.f32 %v885_v37, %v267_v47 }
  0xd2   : > { %349 = vst [vmem:[%s892_s25 + $0x68] sm:$0xff] %v301_v49  ;;  %350 = vst [vmem:[%s892_s25 + $0x70] sm:$0xff] %v302_v50  ;;  %v334_v15 = vmul.f32 %v885_v37, %v268_v52  ;;  %v335_v16 = vmul.f32 %v885_v37, %v269_v53  ;;  %v304_v23 = vmul.f32 %v281_v2, %v238_v54 }
  0xd3   : > { %351 = vst [vmem:[%s892_s25 + $0x78] sm:$0xff] %v303_v51  ;;  %368 = vst [vmem:[%s892_s25 + $0x100] sm:$0xff] %v320_v55  ;;  %v305_v24 = vmul.f32 %v281_v2, %v239_v59  ;;  %v306_v25 = vmul.f32 %v281_v2, %v240_v60  ;;  %v307_v26 = vmul.f32 %v281_v2, %v241_v61 }
  0xd4   : > { %369 = vst [vmem:[%s892_s25 + $0x108] sm:$0xff] %v321_v56  ;;  %370 = vst [vmem:[%s892_s25 + $0x110] sm:$0xff] %v322_v57  ;;  %v308_v27 = vmul.f32 %v281_v2, %v242_v3  ;;  %v309_v28 = vmul.f32 %v281_v2, %v243_v4  ;;  %v310_v29 = vmul.f32 %v281_v2, %v244_v5 }
  0xd5   : > { %371 = vst [vmem:[%s892_s25 + $0x118] sm:$0xff] %v323_v58  ;;  %372 = vst [vmem:[%s892_s25 + $0x120] sm:$0xff] %v324_v62  ;;  %v311_v30 = vmul.f32 %v281_v2, %v245_v10  ;;  %v312_v31 = vmul.f32 %v281_v2, %v246_v11  ;;  %v313_v32 = vmul.f32 %v281_v2, %v247_v12 }
  0xd6   : > { %373 = vst [vmem:[%s892_s25 + $0x128] sm:$0xff] %v325_v63  ;;  %374 = vst [vmem:[%s892_s25 + $0x130] sm:$0xff] %v326_v0  ;;  %v314_v33 = vmul.f32 %v281_v2, %v248_v17  ;;  %v315_v34 = vmul.f32 %v281_v2, %v249_v18  ;;  %v316_v35 = vmul.f32 %v281_v2, %v250_v19 }
  0xd7   : > { %375 = vst [vmem:[%s892_s25 + $0x138] sm:$0xff] %v327_v1  ;;  %376 = vst [vmem:[%s892_s25 + $0x140] sm:$0xff] %v328_v6  ;;  %v317_v36 = vmul.f32 %v281_v2, %v251_v20  ;;  %v318_v37 = vmul.f32 %v281_v2, %v252_v21  ;;  %v319_v38 = vmul.f32 %v281_v2, %v253_v22 }
  0xd8   : > { %377 = vst [vmem:[%s892_s25 + $0x148] sm:$0xff] %v329_v7  ;;  %378 = vst [vmem:[%s892_s25 + $0x150] sm:$0xff] %v330_v8 }
  0xd9   : > { %379 = vst [vmem:[%s892_s25 + $0x158] sm:$0xff] %v331_v9  ;;  %380 = vst [vmem:[%s892_s25 + $0x160] sm:$0xff] %v332_v13 }
  0xda   : > { %381 = vst [vmem:[%s892_s25 + $0x168] sm:$0xff] %v333_v14  ;;  %382 = vst [vmem:[%s892_s25 + $0x170] sm:$0xff] %v334_v15 }
  0xdb   : > { %383 = vst [vmem:[%s892_s25 + $0x178] sm:$0xff] %v335_v16  ;;  %352 = vst [vmem:[%s892_s25 + $0x80] sm:$0xff] %v304_v23 }
  0xdc   : > { %353 = vst [vmem:[%s892_s25 + $0x88] sm:$0xff] %v305_v24  ;;  %354 = vst [vmem:[%s892_s25 + $0x90] sm:$0xff] %v306_v25 }
  0xdd   : > { %355 = vst [vmem:[%s892_s25 + $0x98] sm:$0xff] %v307_v26  ;;  %356 = vst [vmem:[%s892_s25 + $0xa0] sm:$0xff] %v308_v27  ;;  %391 = sbr.rel (!%p777_p9) target bundleno = 258 (0x102), region = 36 }
  0xde   : > { %357 = vst [vmem:[%s892_s25 + $0xa8] sm:$0xff] %v309_v28  ;;  %358 = vst [vmem:[%s892_s25 + $0xb0] sm:$0xff] %v310_v29 }
  0xdf   : > { %359 = vst [vmem:[%s892_s25 + $0xb8] sm:$0xff] %v311_v30  ;;  %360 = vst [vmem:[%s892_s25 + $0xc0] sm:$0xff] %v312_v31 }
  0xe0   : > { %361 = vst [vmem:[%s892_s25 + $0xc8] sm:$0xff] %v313_v32  ;;  %362 = vst [vmem:[%s892_s25 + $0xd0] sm:$0xff] %v314_v33 }
  0xe1   : > { %363 = vst [vmem:[%s892_s25 + $0xd8] sm:$0xff] %v315_v34  ;;  %364 = vst [vmem:[%s892_s25 + $0xe0] sm:$0xff] %v316_v35 }
  0xe2   : > { %365 = vst [vmem:[%s892_s25 + $0xe8] sm:$0xff] %v317_v36  ;;  %366 = vst [vmem:[%s892_s25 + $0xf0] sm:$0xff] %v318_v37 }
  0xe3   : > { %367 = vst [vmem:[%s892_s25 + $0xf8] sm:$0xff] %v319_v38 }
  0xe4   : > { %s1069_s3 = smov (!%p395_p8, %s394_s3), 16 }
  0xe5   : > { %s986_s4 = smul.u32 384, %s1069_s3 }
  0xe7   : > { %s399_s5 = ssub.s32 6144, %s986_s4 }
  0xe8   : > { %400 = vsyncadd %s385_s26, %s399_s5  ;;  %p523_p9 = scmp.ne.s32.totalorder %s986_s4, 0  ;;  %s531_s21 = sshll.u32 %s698_s12, 11 }
  0xe9   : > { %s996_s19 = scalar_lea.hbm %s1054_s2, %s531_s21  ;;  %s525_s24 = sshll.u32 %s1069_s3, 3 }
  0xea   : > { %s408_s27 = sshll.u32 %s892_s25, 4  ;;  %s712_s30 = smov [#allocation5]   ;;  %s1000_s27 = int_to_ptr.vmem [resolvable:$true] %s408_s27 }
  0xeb   : > { %s624_s28 = scalar_lea.vmem %s1000_s27, %s986_s4  ;;  %s628_s7 = sshll.u32 %s712_s30, 4  ;;  %s629_s7 = int_to_ptr.vmem [resolvable:$false] %s628_s7 }
  0xec   : > { %p625_p0 = scmp.ne.s32.totalorder %s1000_s27, %s624_s28  ;;  %s630_s12 = scalar_lea.vmem %s629_s7, 12288 }
  0xed   : > { %p631_p13 = scmp.lt.s32.totalorder %s1000_s27, %s629_s7  ;;  %p632_p1 = scmp.lt.s32.totalorder %s630_s12, %s624_s28 }
  0xee   : > { %p626_p10 = pnand %p625_p0, %p523_p9 }
  0xef   : > { %p633_p2 = por %p632_p1, %p631_p13 }
  0xf0   : > { %p627_p12 = pneg %p626_p10 }
  0xf2   : > { %p634_p4 = pnand %p633_p2, %p627_p12 }
  0xf4   : > { %637 = shalt.err (!%p634_p4)
}
  0xf5   : > { %s638_s20 = scalar_lea.hbm %s996_s19, %s986_s4  ;;  %s642_s25 = scalar_lea.hbm %s1054_s2, 15360 }
  0xf6   : > { %p639_p5 = scmp.ne.s32.totalorder %s996_s19, %s638_s20  ;;  %p643_p7 = scmp.lt.u32.totalorder %s996_s19, %s1054_s2 }
  0xf7   : > { %p644_p11 = scmp.lt.u32.totalorder %s642_s25, %s638_s20  ;;  %p646_p0 = scmp.lt.u32.totalorder %s638_s20, %s996_s19 }
  0xf8   : > { %p640_p6 = pnand %p639_p5, %p523_p9 }
  0xf9   : > { %p645_p8 = por %p644_p11, %p643_p7 }
  0xfa   : > { %p641_p3 = pneg %p640_p6 }
  0xfb   : > { %p647_p10 = por %p646_p0, %p645_p8 }
  0xfd   : > { %p648_p12 = pnand %p647_p10, %p641_p3 }
  0xff   : > { %651 = shalt.err (!%p648_p12)
}
 0x100   : > { %s713_s21 = smov 2048   ;;  %s714_s6 = smov 5120  }
 0x101   : > { %414 = dma.vmem_to_hbm [thread:$0]  (%p523_p9), %s1000_s27, %s986_s4, %s996_s19, %s385_s26, %s713_s21, %s714_s6, %s525_s24  }
 0x102 PF: > { %p540_p13 = scmp.ge.s32.totalorder %s706_s14, 2  ;;  %s423_s16 = sand.u32 1, %s686_s9  }
 0x103   : > { %p1058_p1 = scmp.ne.s32.totalorder %s1057_s23, 0  ;;  %s424_s28 = scalar_lea.sflag [#allocation4], %s423_s16 }
 0x105   : > { %p537_p2 = pnand %p540_p13, %p1058_p1 }
 0x107   : > { %681 = dma.done.wait (!%p537_p2), %s424_s28, 6144  }
 0x108   : > { %683 = vsyncadd (!%p537_p2), %s424_s28, 4294961152  ;;  %s18_s14 = sadd.s32 1, %s706_s14   ;;  %s1059_s9 = smov %s690_s10 }
 0x109   : > { %p15_p4 = scmp.ge.s32.totalorder %s18_s14, 5   ;;  %s1060_s10 = smov %s694_s11 }
 0x10a   : > { %s1061_s11 = smov %s782_s22  ;;  %s1062_s12 = smov %s702_s13 }
 0x10b   : > { %s1063_s13 = smov %s1065_s17  ;;  %17 = sbr.rel (!%p15_p4) target bundleno = 6 (0x6), region = 76 }
 0x112   :  { %429 = vsyncpa [#allocation3], 1 }
 0x113   :  { %431 = vsyncpa [#allocation3 + $0x1], 1 }
 0x114   :  { %432 = vsyncpa [#allocation4], 1 }
 0x115   :  { %434 = vsyncpa [#allocation4 + $0x1], 1 }

</bundles_post_ra>
